<compile_context>
chip_gen: v6e
topology: v6e:2x2x1
jax: 0.10.0
libtpu: 0.0.40
codegen_flags: <defaults>
</compile_context>

<pallas_src>
import functools
import math

import jax
import jax.numpy as jnp
from jax.experimental import pallas as pl
from jax.experimental.pallas import tpu as pltpu


LN_EPS = 1e-5  # nn.LayerNorm default


def _round_up(n, m):
    return ((n + m - 1) // m) * m


def _patch_embed_kernel(p_ref, w_ref, prm_ref, o_ref, *, inv_d):
    # p_ref:   (TM, K8)  bf16 im2col patch tile (K zero-padded to K8)
    # w_ref:   (K8, Dp)  bf16 projection weight (zero-padded K and D)
    # prm_ref: (3,  Dp)  f32 rows = [conv bias, LN gamma, LN beta]
    # o_ref:   (TM, Dp)  bf16 output tile (padded D columns are exactly 0)
    acc = jnp.dot(p_ref[...], w_ref[...], preferred_element_type=jnp.float32)
    acc = acc + prm_ref[0:1, :]              # conv bias; padded cols stay 0

    # Single-pass LayerNorm stats over the real embed_dim (padded cols add 0),
    # hence the explicit 1/D_real factor instead of jnp.mean.
    # NOTE: E[x^2]-E[x]^2 in f32 with a >=0 clamp; switch to a shifted
    # two-pass form if downstream tolerances tighten.
    s = jnp.sum(acc, axis=-1, keepdims=True)
    s2 = jnp.sum(acc * acc, axis=-1, keepdims=True)
    mean = s * inv_d
    var = jnp.maximum(s2 * inv_d - mean * mean, 0.0)
    inv = jax.lax.rsqrt(var + LN_EPS)

    scale = inv * prm_ref[1:2, :]            # (TM, Dp); padded cols -> 0
    shift = prm_ref[2:3, :] - mean * scale   # padded cols -> 0
    o_ref[...] = (acc * scale + shift).astype(o_ref.dtype)


def _im2col_bf16(x, kh, kw, stride, pad_h, pad_w):
    """x: (B, C, H, W) -> bf16 patches (B*Ho*Wo, C*kh*kw), plus (Ho, Wo)."""
    B, C, H, W = x.shape
    x_pad = jnp.pad(x.astype(jnp.bfloat16),
                    ((0, 0), (0, 0), (pad_h, pad_h), (pad_w, pad_w)))
    Hp, Wp = H + 2 * pad_h, W + 2 * pad_w
    Ho = (Hp - kh) // stride + 1
    Wo = (Wp - kw) // stride + 1
    slices = []
    for ki in range(kh):
        for kj in range(kw):
            sl = x_pad[:, :, ki:ki + stride * Ho:stride, kj:kj + stride * Wo:stride]
            slices.append(sl)                                  # (B, C, Ho, Wo)
    # flat feature order is (c, ki, kj), matching PyTorch conv weight
    # (O, C, kh, kw).reshape(O, C*kh*kw)
    p = jnp.stack(slices, axis=2)                              # (B, C, kh*kw, Ho, Wo)
    p = p.reshape(B, C * kh * kw, Ho, Wo)
    p = jnp.transpose(p, (0, 2, 3, 1)).reshape(B * Ho * Wo, C * kh * kw)
    return p, Ho, Wo


def _vmem_need_bytes(tm, k8, dp):
    # Default BlockSpec pipelining double-buffers every operand.
    return (2 * tm * k8 * 2        # patch tiles, bf16
            + 2 * k8 * dp * 2      # weight (constant index_map, still 2 bufs)
            + 2 * tm * dp * 2      # output tiles, bf16
            + 2 * 3 * dp * 4)      # packed bias/gamma/beta, f32


def overlap_patch_embed(x, conv_w, conv_b, ln_g, ln_b, *, stride,
                        tile_m=1024, vmem_budget_bytes=40 * 1024 * 1024):
    """Forward pass of OverlapPatchEmbed.

    x:         (B, C, H, W) NCHW like PyTorch
    conv_w:    (embed_dim, C, kh, kw)
    conv_b:    (embed_dim,)
    ln_g/ln_b: (embed_dim,)
    returns:   (tokens (B, Ho*Wo, embed_dim) in bfloat16, Ho, Wo)
               (cast up at the consumer only if it truly needs f32)
    """
    B = x.shape[0]
    D, C, kh, kw = conv_w.shape
    patches, Ho, Wo = _im2col_bf16(x, kh, kw, stride, kh // 2, kw // 2)
    M, K = patches.shape

    # ---- tiling / padding ----
    # K: only rounded to a sublane multiple; block dims equal the full array
    # dims so no 128-padding of the dominant HBM read stream is needed.
    K8 = _round_up(K, 8)
    # D: padded to 128 so output stores stay lane-dense (unmasked vst).
    Dp = _round_up(D, 128)

    # Biggest token tile that fits the VMEM budget (multiple of 8 sublanes).
    TM = min(tile_m, _round_up(M, 8))
    TM = max(8, (TM // 8) * 8)
    while TM > 8 and _vmem_need_bytes(TM, K8, Dp) > vmem_budget_bytes:
        TM = max(8, _round_up(TM // 2, 8))
    Mp = _round_up(M, TM)

    patches_p = jnp.pad(patches, ((0, Mp - M), (0, K8 - K)))       # bf16, fusable

    w_mat = conv_w.reshape(D, K).T.astype(jnp.bfloat16)            # (K, D)
    w_p = jnp.pad(w_mat, ((0, K8 - K), (0, Dp - D)))

    params = jnp.stack([conv_b, ln_g, ln_b]).astype(jnp.float32)   # (3, D)
    params = jnp.pad(params, ((0, 0), (0, Dp - D)))

    kernel = functools.partial(_patch_embed_kernel, inv_d=1.0 / D)

    vmem_limit = int(min(64 * 1024 * 1024,
                         max(32 * 1024 * 1024,
                             _vmem_need_bytes(TM, K8, Dp) + (4 << 20))))

    out = pl.pallas_call(
        kernel,
        out_shape=jax.ShapeDtypeStruct((Mp, Dp), jnp.bfloat16),
        grid_spec=pltpu.PrefetchScalarGridSpec(
            num_scalar_prefetch=0,
            grid=(Mp // TM,),
            in_specs=[
                pl.BlockSpec((TM, K8), lambda i: (i, 0)),   # patch tile (pipelined)
                pl.BlockSpec((K8, Dp), lambda i: (0, 0)),   # weight, VMEM-resident
                pl.BlockSpec((3, Dp), lambda i: (0, 0)),    # [bias; gamma; beta]
            ],
            out_specs=pl.BlockSpec((TM, Dp), lambda i: (i, 0)),
        ),
        compiler_params=pltpu.CompilerParams(
            dimension_semantics=("parallel",),
            vmem_limit_bytes=vmem_limit),
    )(patches_p, w_p, params)

    # Slice off padded rows/cols in bf16 (half the traffic of the old f32 path).
    out = out[:M, :D]
    return out.reshape(B, Ho * Wo, D), Ho, Wo


def _reference(x, conv_w, conv_b, ln_g, ln_b, *, stride):
    """Pure-JAX reference (lax conv + layernorm) for correctness checking."""
    kh, kw = conv_w.shape[2], conv_w.shape[3]
    y = jax.lax.conv_general_dilated(
        x, conv_w, window_strides=(stride, stride),
        padding=((kh // 2, kh // 2), (kw // 2, kw // 2)),
        dimension_numbers=("NCHW", "OIHW", "NCHW"))
    y = y + conv_b[None, :, None, None]
    B, D, Ho, Wo = y.shape
    t = jnp.transpose(y.reshape(B, D, Ho * Wo), (0, 2, 1))
    mean = t.mean(-1, keepdims=True)
    var = ((t - mean) ** 2).mean(-1, keepdims=True)
    t = (t - mean) * jax.lax.rsqrt(var + LN_EPS) * ln_g + ln_b
    return t, Ho, Wo


if __name__ == "__main__":
    # small config consistent with the module: img=16, patch=7, stride=4
    B, C, H, W = 2, 4, 16, 16
    patch_size, stride, embed_dim = 7, 4, 32

    key = jax.random.PRNGKey(0)
    kx, kw_ = jax.random.split(key)

    x = jax.random.normal(kx, (B, C, H, W), dtype=jnp.float32)

    # deterministic init mirroring _init_weights for nn.Conv2d / nn.LayerNorm
    fan_out = patch_size * patch_size * embed_dim
    conv_w = jax.random.normal(
        kw_, (embed_dim, C, patch_size, patch_size), dtype=jnp.float32
    ) * math.sqrt(2.0 / fan_out)
    conv_b = jnp.zeros((embed_dim,), dtype=jnp.float32)
    ln_g = jnp.ones((embed_dim,), dtype=jnp.float32)
    ln_b = jnp.zeros((embed_dim,), dtype=jnp.float32)

    out, Ho, Wo = overlap_patch_embed(x, conv_w, conv_b, ln_g, ln_b, stride=stride)
    out = jax.block_until_ready(out)

    ref, Hr, Wr = _reference(x, conv_w, conv_b, ln_g, ln_b, stride=stride)
    assert (Ho, Wo) == (Hr, Wr)
    assert out.shape == (B, Ho * Wo, embed_dim)
    # bf16 MXU inputs + bf16 output store (f32 accumulation / f32 LayerNorm)
    # -> relaxed tolerance vs. the f32 reference.
    assert jnp.allclose(out.astype(jnp.float32), ref, atol=5e-2, rtol=5e-2)

    print("KERNEL_OK")
</pallas_src>

<mosaic_0001>
module attributes {stable_mosaic.version = 11 : i64} {
  func.func @_patch_embed_kernel(%arg0: i32, %arg1: memref<32x200xbf16, #tpu.memory_space<vmem>>, %arg2: memref<200x128xbf16, #tpu.memory_space<vmem>>, %arg3: memref<3x128xf32, #tpu.memory_space<vmem>>, %arg4: memref<32x128xbf16, #tpu.memory_space<vmem>>) attributes {dimension_semantics = [#tpu.dimension_semantics<parallel>], iteration_bounds = array<i64: 1>, scalar_prefetch = 0 : i64, scratch_operands = 0 : i64, tpu.core_type = #tpu.core_type<tc>, window_params = [{transform_indices = @transform_0, window_bounds = array<i64: 32, 200>}, {pipeline_mode = #tpu.pipeline_mode<synchronous>, transform_indices = @transform_1, window_bounds = array<i64: 200, 128>}, {pipeline_mode = #tpu.pipeline_mode<synchronous>, transform_indices = @transform_2, window_bounds = array<i64: 3, 128>}, {transform_indices = @transform_3, window_bounds = array<i64: 32, 128>}]} {
    %c0 = arith.constant 0 : index
    %c0_0 = arith.constant 0 : index
    %0 = vector.load %arg1[%c0, %c0_0] : memref<32x200xbf16, #tpu.memory_space<vmem>>, vector<32x200xbf16>
    %c0_1 = arith.constant 0 : index
    %c0_2 = arith.constant 0 : index
    %1 = vector.load %arg2[%c0_1, %c0_2] : memref<200x128xbf16, #tpu.memory_space<vmem>>, vector<200x128xbf16>
    %cst = arith.constant dense<0.000000e+00> : vector<32x128xf32>
    %2 = tpu.matmul %0, %1, %cst {dimension_numbers = #tpu.dot_dimension_numbers<[1], [0], [0], [1], [0, 0, 1, 1], [], []>} : vector<32x200xbf16>, vector<200x128xbf16>, vector<32x128xf32> -> vector<32x128xf32>
    %c0_3 = arith.constant 0 : index
    %c0_4 = arith.constant 0 : index
    %3 = vector.load %arg3[%c0_3, %c0_4] : memref<3x128xf32, #tpu.memory_space<vmem>>, vector<1x128xf32>
    %4 = vector.broadcast %3 : vector<1x128xf32> to vector<32x128xf32>
    %5 = arith.addf %2, %4 : vector<32x128xf32>
    %cst_5 = arith.constant dense<0.000000e+00> : vector<32xf32>
    %6 = vector.multi_reduction <add>, %5, %cst_5 [1] : vector<32x128xf32> to vector<32xf32>
    %7 = vector.shape_cast %6 : vector<32xf32> to vector<32x1xf32>
    %8 = arith.mulf %5, %5 : vector<32x128xf32>
    %cst_6 = arith.constant dense<0.000000e+00> : vector<32xf32>
    %9 = vector.multi_reduction <add>, %8, %cst_6 [1] : vector<32x128xf32> to vector<32xf32>
    %10 = vector.shape_cast %9 : vector<32xf32> to vector<32x1xf32>
    %cst_7 = arith.constant 3.125000e-02 : f32
    %11 = vector.broadcast %cst_7 : f32 to vector<32x1xf32>
    %12 = arith.mulf %7, %11 : vector<32x1xf32>
    %cst_8 = arith.constant 3.125000e-02 : f32
    %13 = vector.broadcast %cst_8 : f32 to vector<32x1xf32>
    %14 = arith.mulf %10, %13 : vector<32x1xf32>
    %15 = arith.mulf %12, %12 : vector<32x1xf32>
    %16 = arith.subf %14, %15 : vector<32x1xf32>
    %cst_9 = arith.constant 0.000000e+00 : f32
    %17 = vector.broadcast %cst_9 : f32 to vector<32x1xf32>
    %18 = arith.maximumf %16, %17 : vector<32x1xf32>
    %cst_10 = arith.constant 9.99999974E-6 : f32
    %19 = vector.broadcast %cst_10 : f32 to vector<32x1xf32>
    %20 = arith.addf %18, %19 : vector<32x1xf32>
    %21 = math.rsqrt %20 : vector<32x1xf32>
    %c1 = arith.constant 1 : index
    %c0_11 = arith.constant 0 : index
    %22 = vector.load %arg3[%c1, %c0_11] : memref<3x128xf32, #tpu.memory_space<vmem>>, vector<1x128xf32>
    %23 = vector.broadcast %21 : vector<32x1xf32> to vector<32x128xf32>
    %24 = vector.broadcast %22 : vector<1x128xf32> to vector<32x128xf32>
    %25 = arith.mulf %23, %24 : vector<32x128xf32>
    %c2 = arith.constant 2 : index
    %c0_12 = arith.constant 0 : index
    %26 = vector.load %arg3[%c2, %c0_12] : memref<3x128xf32, #tpu.memory_space<vmem>>, vector<1x128xf32>
    %27 = vector.broadcast %12 : vector<32x1xf32> to vector<32x128xf32>
    %28 = arith.mulf %27, %25 : vector<32x128xf32>
    %29 = vector.broadcast %26 : vector<1x128xf32> to vector<32x128xf32>
    %30 = arith.subf %29, %28 : vector<32x128xf32>
    %31 = arith.mulf %5, %25 : vector<32x128xf32>
    %32 = arith.addf %31, %30 : vector<32x128xf32>
    %33 = arith.truncf %32 : vector<32x128xf32> to vector<32x128xbf16>
    %c0_13 = arith.constant 0 : index
    %c0_14 = arith.constant 0 : index
    %34 = vector.load %arg4[%c0_13, %c0_14] : memref<32x128xbf16, #tpu.memory_space<vmem>>, vector<32x128xbf16>
    tpu.vector_store %arg4[%c0_13, %c0_14], %33 {strides = array<i32>} : memref<32x128xbf16, #tpu.memory_space<vmem>>, vector<32x128xbf16>,
    return
  }
  func.func @transform_0(%arg0: i32) -> (i32, i32) {
    %c0_i32 = arith.constant 0 : i32
    %c0_i32_0 = arith.constant 0 : i32
    return %arg0, %c0_i32 : i32, i32
  }
  func.func @transform_1(%arg0: i32) -> (i32, i32) {
    %c0_i32 = arith.constant 0 : i32
    %c0_i32_0 = arith.constant 0 : i32
    %c0_i32_1 = arith.constant 0 : i32
    return %c0_i32, %c0_i32_0 : i32, i32
  }
  func.func @transform_2(%arg0: i32) -> (i32, i32) {
    %c0_i32 = arith.constant 0 : i32
    %c0_i32_0 = arith.constant 0 : i32
    %c0_i32_1 = arith.constant 0 : i32
    return %c0_i32, %c0_i32_0 : i32, i32
  }
  func.func @transform_3(%arg0: i32) -> (i32, i32) {
    %c0_i32 = arith.constant 0 : i32
    %c0_i32_0 = arith.constant 0 : i32
    return %arg0, %c0_i32 : i32, i32
  }
}

</mosaic_0001>

<bundles_post_ra>
// kernel: tpu_custom_call.1
= control target key start
LH: loop header
LB: loop body
LE: loop exit
PB: predicated region body
PF: predicated region fallthrough
CT: control target
= control target key end

     0   :  { %8 = vsyncpa [#allocation3], 0  ;;  %s644_s0 = inlined_call_operand.hbm [shape: bf16[32,200], index: 0, kind: input, shape index: {}]   ;;  %s645_s1 = inlined_call_operand.hbm [shape: bf16[200,128], index: 1, kind: input, shape index: {}]   ;;  %s646_s2 = inlined_call_operand.hbm [shape: f32[3,128], index: 2, kind: input, shape index: {}]   ;;  %s647_s3 = inlined_call_operand.hbm [shape: bf16[32,128], index: 3, kind: output, shape index: {}]  }
   0x1   :  { %9 = vsyncpa [#allocation6], 0 }
   0x2   :  { %10 = vsyncpa [#allocation4], 0  ;;  %s547_s12 = smov [#allocation5]  }
   0x3   :  { %s28_s13 = sshll.u32 %s547_s12, 4  ;;  %s29_s13 = int_to_ptr.vmem [resolvable:$true] %s28_s13 }
   0x4   :  { %s469_s14 = scalar_lea.vmem %s29_s13, 1600  ;;  %p474_p1 = scmp.lt.s32.totalorder %s29_s13, %s29_s13 }
   0x5   :  { %p470_p0 = scmp.ne.s32.totalorder %s29_s13, %s469_s14  ;;  %p475_p2 = scmp.lt.s32.totalorder %s469_s14, %s469_s14 }
   0x7   :  { %p476_p3 = por %p475_p2, %p474_p1 }
   0x9   :  { %p477_p4 = pnand %p476_p3, %p470_p0 }
   0xb   :  { %480 = shalt.err (!%p477_p4)
}
   0xc   :  { %s548_s15 = smov 64   ;;  %s549_s16 = smov 4  }
   0xd   :  { %34 = dma.hbm_to_vmem [thread:$0]  %s645_s1, 1600, %s29_s13, [#allocation6], %s548_s15, %s548_s15, %s549_s16  }
   0xe   :  { %s550_s19 = smov [#allocation2]  }
   0xf   :  { %s16_s20 = sshll.u32 %s550_s19, 4  ;;  %s17_s20 = int_to_ptr.vmem [resolvable:$true] %s16_s20 }
  0x10   :  { %s489_s21 = scalar_lea.vmem %s17_s20, 512  ;;  %p494_p6 = scmp.lt.s32.totalorder %s17_s20, %s17_s20 }
  0x11   :  { %p490_p5 = scmp.ne.s32.totalorder %s17_s20, %s489_s21  ;;  %p495_p7 = scmp.lt.s32.totalorder %s489_s21, %s489_s21 }
  0x13   :  { %p496_p8 = por %p495_p7, %p494_p6 }
  0x15   :  { %p497_p9 = pnand %p496_p8, %p490_p5 }
  0x17   :  { %500 = shalt.err (!%p497_p9)
}
  0x18   :  { %s551_s22 = smov 128   ;;  %s552_s23 = smov 8  }
  0x19   :  { %22 = dma.hbm_to_vmem [thread:$0]  %s644_s0, 512, %s17_s20, [#allocation3], %s551_s22, %s551_s22, %s552_s23  }
  0x1a   :  { %s553_s26 = smov [#allocation7]  }
  0x1b   :  { %s41_s27 = sshll.u32 %s553_s26, 4  ;;  %s42_s27 = int_to_ptr.vmem [resolvable:$true] %s41_s27 }
  0x1c   :  { %s509_s1 = scalar_lea.vmem %s42_s27, 64  ;;  %p514_p11 = scmp.lt.s32.totalorder %s42_s27, %s42_s27 }
  0x1d   :  { %p510_p10 = scmp.ne.s32.totalorder %s42_s27, %s509_s1  ;;  %p515_p12 = scmp.lt.s32.totalorder %s509_s1, %s509_s1 }
  0x1f   :  { %p516_p13 = por %p515_p12, %p514_p11 }
  0x21   :  { %p517_p0 = pnand %p516_p13, %p510_p10 }
  0x23   :  { %520 = shalt.err (!%p517_p0)
}
  0x24   :  { %44 = dma.hbm_to_vmem [thread:$0]  %s646_s2, 64, %s42_s27, [#allocation6]  }
  0x25   :  { %541 = dma.done.wait [#allocation3], 512  }
  0x26   :  { %542 = vsyncadd [#allocation3], 4294966784 }
  0x27   :  { %543 = dma.done.wait [#allocation6], 1664  }
  0x28   :  { %544 = vsyncadd [#allocation6], 4294965632  ;;  %v554_v0 = vmov 0   ;;  %v434_v1 = vld [vmem:[#allocation5 + $0x38] sm:$0xff]   ;;  %v435_v2 = vld [vmem:[#allocation5 + $0x30] sm:$0xff]   ;;  %vm182_vm0 = vcmask 588800  }
  0x29   :  { %193 = vmatprep.subr.bf16.mxu0 %v554_v0  ;;  %399 = vmatprep.subr.bf16.mxu1 %v554_v0  ;;  %v436_v3 = vld [vmem:[#allocation5 + $0x28] sm:$0xff]   ;;  %v437_v4 = vld [vmem:[#allocation5 + $0x20] sm:$0xff]   ;;  %v438_v6 = vld [vmem:[#allocation5 + $0x18] sm:$0xff]   ;;  %vm189_vm1 = vcmask 1043456   ;;  %s555_s0 = smov [#allocation8]  }
  0x2a   :  { %194 = vmatpush1.bf16.msra.mxu0 %v434_v1  ;;  %412 = vmatpush1.bf16.msra.mxu1 %v434_v1  ;;  %v449_v5 = vld [vmem:[#allocation2 + $0x4] ss:$8 sps:$4 sm:$0xff]   ;;  %v452_v7 = vld [vmem:[#allocation2 + $0x14] ss:$8 sps:$4 sm:$0xff]   ;;  %v442_v11 = vld [vmem:[#allocation5 + $0x60] ss:$0 sps:$4 sm:$0xff]  }
  0x2b   :  { %195 = vmatprep.subr.bf16.mxu0 %v554_v0  ;;  %400 = vmatprep.subr.bf16.mxu1 %v554_v0  ;;  %v439_v8 = vld [vmem:[#allocation5 + $0x10] sm:$0xff]   ;;  %v440_v9 = vld [vmem:[#allocation5 + $0x8] sm:$0xff]   ;;  %v441_v10 = vld [vmem:[#allocation5] sm:$0xff]   ;;  %v191_v12 = vsel %vm189_vm1, %v442_v11, 0  ;;  %s345_s2 = sshll.u32 %s555_s0, 4  ;;  %s346_s2 = int_to_ptr.vmem [resolvable:$true] %s345_s2 }
  0x2c   :  { %376 = vmatprep.mubr.msk.bf16.mxu0 %vm182_vm0, %v449_v5  ;;  %377 = vmatprep.mubr.msk.bf16.mxu1 %vm182_vm0, %v452_v7  ;;  %v443_v13 = vld [vmem:[#allocation5 + $0x58] sm:$0xff]   ;;  %v444_v14 = vld [vmem:[#allocation5 + $0x50] sm:$0xff]   ;;  %v445_v15 = vld [vmem:[#allocation5 + $0x48] sm:$0xff]   ;;  %s521_s30 = scalar_lea.vmem %s346_s2, 256  ;;  %p526_p2 = scmp.lt.s32.totalorder %s346_s2, %s346_s2 }
  0x2d   :  { %v446_v16 = vld [vmem:[#allocation5 + $0x40] sm:$0xff]   ;;  %v450_v18 = vld [vmem:[#allocation2 + $0x10] ss:$8 sps:$4 sm:$0xff]   ;;  %p522_p1 = scmp.ne.s32.totalorder %s346_s2, %s521_s30  ;;  %p527_p3 = scmp.lt.s32.totalorder %s521_s30, %s521_s30 }
  0x2e   :  { %196 = vmatpush1.bf16.msra.mxu0 %v435_v2  ;;  %413 = vmatpush1.bf16.msra.mxu1 %v435_v2  ;;  %v447_v17 = vld [vmem:[#allocation2] ss:$8 sps:$4 sm:$0xff]   ;;  %v358_v19 = vld [vmem:[#allocation7] ss:$0 sm:$0xff] }
  0x2f   :  { %197 = vmatprep.subr.bf16.mxu0 %v554_v0  ;;  %401 = vmatprep.subr.bf16.mxu1 %v554_v0  ;;  %p528_p4 = por %p527_p3, %p526_p2 }
  0x31   :  { %p529_p5 = pnand %p528_p4, %p522_p1 }
  0x32   :  { %198 = vmatpush1.bf16.msra.mxu0 %v436_v3  ;;  %414 = vmatpush1.bf16.msra.mxu1 %v436_v3 }
  0x33   :  { %199 = vmatprep.subr.bf16.mxu0 %v554_v0  ;;  %402 = vmatprep.subr.bf16.mxu1 %v554_v0 }
  0x36   :  { %200 = vmatpush1.bf16.msra.mxu0 %v437_v4  ;;  %415 = vmatpush1.bf16.msra.mxu1 %v437_v4  ;;  %v378_v4 = vld [vmem:[#allocation7 + $0x1] ss:$0 sm:$0xff] }
  0x37   :  { %201 = vmatprep.subr.bf16.mxu0 %v554_v0  ;;  %403 = vmatprep.subr.bf16.mxu1 %v554_v0 }
  0x3a   :  { %202 = vmatpush1.bf16.msra.mxu0 %v438_v6  ;;  %416 = vmatpush1.bf16.msra.mxu1 %v438_v6 }
  0x3b   :  { %203 = vmatprep.subr.bf16.mxu0 %v554_v0  ;;  %404 = vmatprep.subr.bf16.mxu1 %v554_v0 }
  0x3e   :  { %204 = vmatpush1.bf16.msra.mxu0 %v439_v8  ;;  %417 = vmatpush1.bf16.msra.mxu1 %v439_v8 }
  0x3f   :  { %205 = vmatprep.subr.bf16.mxu0 %v554_v0  ;;  %405 = vmatprep.subr.bf16.mxu1 %v554_v0 }
  0x42   :  { %206 = vmatpush1.bf16.msra.mxu0 %v440_v9  ;;  %418 = vmatpush1.bf16.msra.mxu1 %v440_v9  ;;  %v379_v9 = vld [vmem:[#allocation7 + $0x2] ss:$0 sm:$0xff] }
  0x43   :  { %207 = vmatprep.subr.bf16.mxu0 %v554_v0  ;;  %406 = vmatprep.subr.bf16.mxu1 %v554_v0 }
  0x46   :  { %208 = vmatpush1.bf16.msra.mxu0 %v441_v10  ;;  %419 = vmatpush1.bf16.msra.mxu1 %v441_v10 }
  0x47   :  { %215 = vmatprep.subr.bf16.mxu0 %v554_v0  ;;  %407 = vmatprep.subr.bf16.mxu1 %v554_v0 }
  0x4a   :  { %216 = vmatpush2.bf16.msra.mxu0 %v191_v12  ;;  %420 = vmatpush2.bf16.msra.mxu1 %v191_v12 }
  0x4b   :  { %217 = vmatprep.subr.bf16.mxu0 %v554_v0  ;;  %408 = vmatprep.subr.bf16.mxu1 %v554_v0 }
  0x4e   :  { %218 = vmatpush2.bf16.msra.mxu0 %v443_v13  ;;  %421 = vmatpush2.bf16.msra.mxu1 %v443_v13 }
  0x4f   :  { %219 = vmatprep.subr.bf16.mxu0 %v554_v0  ;;  %409 = vmatprep.subr.bf16.mxu1 %v554_v0 }
  0x52   :  { %220 = vmatpush2.bf16.msra.mxu0 %v444_v14  ;;  %422 = vmatpush2.bf16.msra.mxu1 %v444_v14 }
  0x53   :  { %221 = vmatprep.subr.bf16.mxu0 %v554_v0  ;;  %410 = vmatprep.subr.bf16.mxu1 %v554_v0 }
  0x56   :  { %222 = vmatpush2.bf16.msra.mxu0 %v445_v15  ;;  %423 = vmatpush2.bf16.msra.mxu1 %v445_v15 }
  0x57   :  { %223 = vmatprep.subr.bf16.mxu0 %v554_v0  ;;  %411 = vmatprep.subr.bf16.mxu1 %v554_v0 }
  0x5a   :  { %224 = vmatpush2.bf16.msra.mxu0 %v446_v16  ;;  %424 = vmatpush2.bf16.msra.mxu1 %v446_v16 }
  0x5d   :  { %226 = vmatmul.mubr.bf16.vlgmr.msra.gmra.mxu0 %v447_v17  ;;  %234 = vmatmul.mubr.bf16.vlgmr.msra.gmra.mxu1 %v450_v18 }
 0x11d   :  { %v227_v20 = vpop.f32.mrf.mxu0  ;;  %v235_v21 = vpop.f32.mrf.mxu1 }
 0x11e   :  { %v614_v22 = vadd.f32 %v358_v19, %v227_v20  ;;  %v616_v23 = vadd.f32 %v358_v19, %v235_v21 }
 0x11f   :  { %v229_v24 = vpop.f32.mrf.mxu0  ;;  %v237_v25 = vpop.f32.mrf.mxu1 }
 0x120   :  { %246 = vadd.xlane.f32.xlu1 %v616_v23  ;;  %242 = vadd.xlane.f32.xlu0 %v614_v22  ;;  %v250_v30 = vmul.f32 %v614_v22, %v614_v22  ;;  %v252_v35 = vmul.f32 %v616_v23, %v616_v23 }
 0x121   :  { %v230_v26 = vpop.f32.mrf.mxu0  ;;  %v238_v27 = vpop.f32.mrf.mxu1 }
 0x122   :  { %v620_v28 = vadd.f32 %v358_v19, %v230_v26  ;;  %v622_v29 = vadd.f32 %v358_v19, %v238_v27 }
 0x123   :  { %v232_v31 = vpop.f32.mrf.mxu0  ;;  %v240_v32 = vpop.f32.mrf.mxu1 }
 0x124   :  { %248 = vadd.xlane.f32.xlu1 %v622_v29  ;;  %254 = vadd.xlane.f32.xlu0 %v250_v30  ;;  %v251_v33 = vmul.f32 %v620_v28, %v620_v28  ;;  %v253_v34 = vmul.f32 %v622_v29, %v622_v29 }
 0x128   :  { %256 = vadd.xlane.f32.xlu1 %v251_v33  ;;  %244 = vadd.xlane.f32.xlu0 %v620_v28 }
 0x12c   :  { %260 = vadd.xlane.f32.xlu1 %v253_v34  ;;  %258 = vadd.xlane.f32.xlu0 %v252_v35 }
 0x1a9   :  { %v247_v36 = vpop.xlane.xlu1 %246  ;;  %v243_v37 = vpop.xlane.xlu0 %242 }
 0x1aa   :  { %v262_v38 = vmul.f32 0.03125, %v243_v37  ;;  %v264_v44 = vmul.f32 0.03125, %v247_v36 }
 0x1ac   :  { %v270_v41 = vmul.f32 %v262_v38, %v262_v38  ;;  %v272_v53 = vmul.f32 %v264_v44, %v264_v44 }
 0x1ad   :  { %v249_v39 = vpop.xlane.xlu1 %248  ;;  %v255_v40 = vpop.xlane.xlu0 %254 }
 0x1ae   :  { %v266_v42 = vmul.f32 0.03125, %v255_v40  ;;  %v265_v45 = vmul.f32 0.03125, %v249_v39 }
 0x1b0   :  { %v274_v43 = vsub.f32 %v266_v42, %v270_v41  ;;  %v273_v54 = vmul.f32 %v265_v45, %v265_v45 }
 0x1b1   :  { %v257_v46 = vpop.xlane.xlu1 %256  ;;  %v245_v47 = vpop.xlane.xlu0 %244 }
 0x1b2   :  { %v278_v48 = vmax.f32 %v274_v43, 0.0  ;;  %v263_v49 = vmul.f32 0.03125, %v245_v47  ;;  %v267_v51 = vmul.f32 0.03125, %v257_v46 }
 0x1b4   :  { %v282_v50 = vadd.f32 1e-05, %v278_v48  ;;  %v271_v52 = vmul.f32 %v263_v49, %v263_v49 }
 0x1b5   :  { %v261_v55 = vpop.xlane.xlu1 %260  ;;  %v259_v56 = vpop.xlane.xlu0 %258 }
 0x1b6   :  { %453 = vrsqrt.f32 %v282_v50  ;;  %v275_v57 = vsub.f32 %v267_v51, %v271_v52  ;;  %v269_v58 = vmul.f32 0.03125, %v261_v55  ;;  %v268_v59 = vmul.f32 0.03125, %v259_v56 }
 0x1b8   :  { %v279_v60 = vmax.f32 %v275_v57, 0.0  ;;  %v277_v61 = vsub.f32 %v269_v58, %v273_v54  ;;  %v276_v62 = vsub.f32 %v268_v59, %v272_v53 }
 0x1ba   :  { %v283_v63 = vadd.f32 1e-05, %v279_v60  ;;  %v281_v0 = vmax.f32 %v277_v61, 0.0  ;;  %v280_v1 = vmax.f32 %v276_v62, 0.0 }
 0x1bc   :  { %455 = vrsqrt.f32 %v283_v63  ;;  %v285_v2 = vadd.f32 1e-05, %v281_v0  ;;  %v284_v3 = vadd.f32 1e-05, %v280_v1 }
 0x1be   :  { %457 = vrsqrt.f32 %v285_v2 }
 0x1bf   :  { %459 = vrsqrt.f32 %v284_v3 }
 0x1c3   :  { %v454_v5 = vpop.eup %453 }
 0x1c4   :  { %v295_v6 = vmul.f32 %v454_v5, %v378_v4 }
 0x1c6   :  { %v300_v7 = vmul.f32 %v295_v6, %v262_v38  ;;  %v312_v20 = vmul.f32 %v295_v6, %v614_v22 }
 0x1c8   :  { %v308_v15 = vsub.f32 %v379_v9, %v300_v7 }
 0x1c9   :  { %v456_v8 = vpop.eup %455 }
 0x1ca   :  { %v296_v10 = vmul.f32 %v456_v8, %v378_v4  ;;  %v316_v27 = vadd.f32 %v312_v20, %v308_v15 }
 0x1cb   :  { %v458_v11 = vpop.eup %457 }
 0x1cc   :  { %v460_v12 = vpop.eup %459  ;;  %v301_v13 = vmul.f32 %v296_v10, %v263_v49  ;;  %v298_v14 = vmul.f32 %v458_v11, %v378_v4  ;;  %v313_v18 = vmul.f32 %v296_v10, %v620_v28 }
 0x1cd   :  { %v297_v16 = vmul.f32 %v460_v12, %v378_v4 }
 0x1ce   :  { %v309_v17 = vsub.f32 %v379_v9, %v301_v13  ;;  %v303_v19 = vmul.f32 %v298_v14, %v265_v45  ;;  %v315_v26 = vmul.f32 %v298_v14, %v622_v29 }
 0x1cf   :  { %v302_v21 = vmul.f32 %v297_v16, %v264_v44  ;;  %v314_v31 = vmul.f32 %v297_v16, %v616_v23 }
 0x1d0   :  { %v317_v24 = vadd.f32 %v313_v18, %v309_v17  ;;  %v311_v25 = vsub.f32 %v379_v9, %v303_v19 }
 0x1d1   :  { %v310_v30 = vsub.f32 %v379_v9, %v302_v21 }
 0x1d2   :  { %v319_v32 = vadd.f32 %v315_v26, %v311_v25  ;;  %v391_v33 = vpack.c.bf16 %v317_v24, %v316_v27 }
 0x1d3   :  { %v318_v34 = vadd.f32 %v314_v31, %v310_v30 }
 0x1d4   :  { %392 = vst [vmem:[#allocation8] sm:$0xff] %v391_v33  }
 0x1d5   :  { %v396_v35 = vpack.c.bf16 %v319_v32, %v318_v34 }
 0x1d7   :  { %398 = vst [vmem:[#allocation8 + $0x8] sm:$0xff] %v396_v35  }
 0x1d8   :  { %532 = shalt.err (!%p529_p5)
}
 0x1d9   :  { %351 = dma.vmem_to_hbm [thread:$0]  %s346_s2, 256, %s647_s3, [#allocation4], %s548_s15, %s548_s15, %s549_s16  }
 0x1da   :  { %545 = dma.done.wait [#allocation4], 256  }
 0x1db   :  { %546 = vsyncadd [#allocation4], 4294967040 }
 0x1dc   :  { %355 = vsyncpa [#allocation3], 1 }
 0x1dd   :  { %356 = vsyncpa [#allocation6], 1 }
 0x1de   :  { %357 = vsyncpa [#allocation4], 1 }

</bundles_post_ra>
